<compile_context>
chip_gen: v5e
topology: v5e:2x2
jax: 0.10.0
libtpu: 0.0.40
codegen_flags: <defaults>
</compile_context>

<pallas_src>
import functools
import math

import jax
import jax.numpy as jnp
from jax.experimental import pallas as pl
from jax.experimental.pallas import tpu as pltpu

LN_EPS = 1e-5


def _round_up(x, m):
    return ((x + m - 1) // m) * m


def _edge_encoder_kernel(p_ref, w1_ref, w2_ref, s_ref, vec_ref, out_ref):
    """One grid step over TM packed rows (G logical rows per packed row).

    p_ref   : (TM, G*E*E)  P[n, i*E+j] = rel_pos[n,i] * rotate_mat[n,i,j]
    w1_ref  : (G*E*E, G*D) block-diag( tile(w1, (E,1)) )
    w2_ref  : (G*D, G*D)   block-diag( w2 )
    s_ref   : (G*D, G*D)   block-diag( ones(D,D)/D )  -- LayerNorm averaging
    vec_ref : (4, G*D)     rows: b1, gamma, beta, b2 (tiled per lane group)
    out_ref : (TM, G*D)
    """
    p = p_ref[...].astype(jnp.float32)
    vec = vec_ref[...].astype(jnp.float32)
    b1 = vec[0:1, :]
    gamma = vec[1:2, :]
    beta = vec[2:3, :]
    b2 = vec[3:4, :]

    # Rotation + Linear1 fused into one lane-dense MXU matmul.
    x = jnp.dot(p, w1_ref[...].astype(jnp.float32),
                preferred_element_type=jnp.float32) + b1            # (TM, G*D)

    # LayerNorm: per-group mean / E[x^2] via block-diag averaging matmuls on
    # the MXU; var = E[x^2] - mean^2 (biased, matches nn.LayerNorm).
    s = s_ref[...].astype(jnp.float32)
    mean = jnp.dot(x, s, preferred_element_type=jnp.float32)
    msq = jnp.dot(x * x, s, preferred_element_type=jnp.float32)
    var = jnp.maximum(msq - mean * mean, 0.0)
    scale = gamma * jax.lax.rsqrt(var + LN_EPS)      # gamma folded into scale
    xn = (x - mean) * scale + beta

    # ReLU
    xn = jnp.maximum(xn, 0.0)

    # Linear2: one lane-dense MXU matmul against block-diag(w2).
    out = jnp.dot(xn, w2_ref[...].astype(jnp.float32),
                  preferred_element_type=jnp.float32) + b2
    out_ref[...] = out.astype(out_ref.dtype)


@functools.partial(jax.jit, static_argnames=("tile_n", "out_dtype"))
def cs_edge_encoder(rel_pos, rotate_mat, params, *, tile_n=16384, out_dtype=None):
    """rel_pos: [N, E], rotate_mat: [N, E, E] -> [N, D]."""
    N, E = rel_pos.shape
    w1 = params["w1"]            # (E, D)
    b1 = params["b1"]            # (D,)
    gamma = params["ln_gamma"]   # (D,)
    beta = params["ln_beta"]     # (D,)
    w2 = params["w2"]            # (D, D)
    b2 = params["b2"]            # (D,)
    D = w1.shape[1]
    # TODO(synk): pass out_dtype=jnp.bfloat16 if the consumer tolerates it —
    # the (N, D) output is the dominant HBM stream; accumulation stays f32.
    out_dtype = rel_pos.dtype if out_dtype is None else jnp.dtype(out_dtype)

    # --- lane packing: put G logical rows side-by-side so the output block is
    #     a multiple of 128 lanes (dense, unmasked stores + dense writeback).
    if D % 128 == 0:
        G = 1
    else:
        G = math.lcm(D, 128) // D
        if G * D > 512:            # keep block-diag params small for odd D
            G = 1
    EE = E * E
    GW = G * EE
    GD = G * D

    # --- tile policy: big tiles amortize ~0.35us/step overhead; keep >=4 grid
    #     steps for large N (>=2 per TensorCore on v7x so pipelining survives
    #     megacore sharding); respect a conservative VMEM budget (v7x: 64 MiB
    #     physical VMEM).
    align = 8 * G
    min_steps = 4
    cap_steps = max(align, _round_up(pl.cdiv(N, min_steps), align))
    vmem_budget = 24 * 1024 * 1024
    row_bytes = 4 * (2 * EE + 2 * D + 7 * D)   # dbl-buffered io + f32 temps / row
    cap_vmem = max(align, (vmem_budget // row_bytes) // align * align)
    tile_n = int(_round_up(min(max(int(tile_n), align), cap_steps, cap_vmem),
                           align))
    N_pad = _round_up(N, tile_n)
    tile_m = tile_n // G
    grid = (N_pad // tile_n,)

    # --- fuse the bmm into the wrapper pack: P[n, i*E+j] = rel[n,i]*rot[n,i,j]
    p = (rel_pos[:, :, None] * rotate_mat).reshape(N, EE)
    if N_pad != N:
        p = jnp.pad(p, ((0, N_pad - N), (0, 0)))
    p = p.reshape(N_pad // G, GW)

    # --- consolidated, lane-dense parameters.
    f32 = jnp.float32
    w1t = jnp.tile(w1.astype(f32), (E, 1))                   # (E*E, D): row i*E+j -> w1[j]
    eye_g = jnp.eye(G, dtype=f32)
    w1_big = jnp.kron(eye_g, w1t)                            # (G*E*E, G*D)
    w2_big = jnp.kron(eye_g, w2.astype(f32))                 # (G*D, G*D)
    s_big = jnp.kron(eye_g, jnp.full((D, D), 1.0 / D, f32))  # (G*D, G*D)
    vec = jnp.stack([jnp.tile(b1.astype(f32), G),
                     jnp.tile(gamma.astype(f32), G),
                     jnp.tile(beta.astype(f32), G),
                     jnp.tile(b2.astype(f32), G)], axis=0)   # (4, G*D)

    flops = int(N_pad * (2 * EE * D + 4 * D * D + 2 * D * D + 10 * D))
    bytes_accessed = int(4 * N_pad * EE
                         + jnp.dtype(out_dtype).itemsize * N_pad * D
                         + 4 * (GW * GD + 2 * GD * GD + 4 * GD))

    out_wide = pl.pallas_call(
        _edge_encoder_kernel,
        out_shape=jax.ShapeDtypeStruct((N_pad // G, GD), out_dtype),
        grid_spec=pltpu.PrefetchScalarGridSpec(
            num_scalar_prefetch=0,
            grid=grid,
            in_specs=[
                pl.BlockSpec((tile_m, GW), lambda i: (i, 0)),   # packed P
                pl.BlockSpec((GW, GD), lambda i: (0, 0)),       # block-diag w1'
                pl.BlockSpec((GD, GD), lambda i: (0, 0)),       # block-diag w2
                pl.BlockSpec((GD, GD), lambda i: (0, 0)),       # LN averaging S
                pl.BlockSpec((4, GD), lambda i: (0, 0)),        # b1/gamma/beta/b2
            ],
            out_specs=pl.BlockSpec((tile_m, GD), lambda i: (i, 0)),
        ),
        compiler_params=pltpu.CompilerParams(
            dimension_semantics=("parallel",),
            vmem_limit_bytes=32 * 1024 * 1024),
        cost_estimate=pl.CostEstimate(
            flops=flops, transcendentals=N_pad, bytes_accessed=bytes_accessed),
    )(p, w1_big, w2_big, s_big, vec)

    out = out_wide.reshape(N_pad, D)
    return out[:N] if N_pad != N else out


def make_params(key, edge_dim, embed_dim):
    """Deterministic synthetic parameters (stand-in for init_weights)."""
    k1, k2, k3, k4 = jax.random.split(key, 4)
    w1 = jax.random.normal(k1, (edge_dim, embed_dim), jnp.float32) * 0.1
    b1 = jax.random.normal(k2, (embed_dim,), jnp.float32) * 0.01
    w2 = jax.random.normal(k3, (embed_dim, embed_dim), jnp.float32) * 0.1
    b2 = jax.random.normal(k4, (embed_dim,), jnp.float32) * 0.01
    return {
        "w1": w1, "b1": b1,
        "ln_gamma": jnp.ones((embed_dim,), jnp.float32),
        "ln_beta": jnp.zeros((embed_dim,), jnp.float32),
        "w2": w2, "b2": b2,
    }


def reference(rel_pos, rotate_mat, params):
    rotated = jnp.einsum("ne,ned->nd", rel_pos, rotate_mat)
    x = rotated @ params["w1"] + params["b1"]
    mean = jnp.mean(x, axis=-1, keepdims=True)
    var = jnp.mean(jnp.square(x - mean), axis=-1, keepdims=True)
    xn = (x - mean) / jnp.sqrt(var + LN_EPS)
    xn = xn * params["ln_gamma"] + params["ln_beta"]
    xn = jnp.maximum(xn, 0.0)
    return xn @ params["w2"] + params["b2"]


if __name__ == "__main__":
    key = jax.random.PRNGKey(0)
    k_rel, k_rot, k_par = jax.random.split(key, 3)

    N, EDGE_DIM, EMBED_DIM = 16, 2, 32   # small, consistent with the module

    rel_pos = jax.random.normal(k_rel, (N, EDGE_DIM), jnp.float32)
    rotate_mat = jax.random.normal(k_rot, (N, EDGE_DIM, EDGE_DIM), jnp.float32)
    params = make_params(k_par, EDGE_DIM, EMBED_DIM)

    out = cs_edge_encoder(rel_pos, rotate_mat, params)
    out = jax.block_until_ready(out)

    ref = reference(rel_pos, rotate_mat, params)
    assert out.shape == (N, EMBED_DIM)
    assert jnp.allclose(out, ref, atol=1e-4, rtol=1e-4), "mismatch vs reference"

    print("KERNEL_OK")
</pallas_src>

<mosaic_0001>
module attributes {stable_mosaic.version = 11 : i64} {
  func.func @_edge_encoder_kernel(%arg0: i32, %arg1: memref<8x16xf32, #tpu.memory_space<vmem>>, %arg2: memref<16x128xf32, #tpu.memory_space<vmem>>, %arg3: memref<128x128xf32, #tpu.memory_space<vmem>>, %arg4: memref<128x128xf32, #tpu.memory_space<vmem>>, %arg5: memref<4x128xf32, #tpu.memory_space<vmem>>, %arg6: memref<8x128xf32, #tpu.memory_space<vmem>>) attributes {dimension_semantics = [#tpu.dimension_semantics<parallel>], iteration_bounds = array<i64: 1>, scalar_prefetch = 0 : i64, scratch_operands = 0 : i64, tpu.core_type = #tpu.core_type<tc>, window_params = [{transform_indices = @transform_0, window_bounds = array<i64: 8, 16>}, {pipeline_mode = #tpu.pipeline_mode<synchronous>, transform_indices = @transform_1, window_bounds = array<i64: 16, 128>}, {pipeline_mode = #tpu.pipeline_mode<synchronous>, transform_indices = @transform_2, window_bounds = array<i64: 128, 128>}, {pipeline_mode = #tpu.pipeline_mode<synchronous>, transform_indices = @transform_3, window_bounds = array<i64: 128, 128>}, {pipeline_mode = #tpu.pipeline_mode<synchronous>, transform_indices = @transform_4, window_bounds = array<i64: 4, 128>}, {transform_indices = @transform_5, window_bounds = array<i64: 8, 128>}]} {
    %c0 = arith.constant 0 : index
    %c0_0 = arith.constant 0 : index
    %0 = vector.load %arg1[%c0, %c0_0] : memref<8x16xf32, #tpu.memory_space<vmem>>, vector<8x16xf32>
    %c0_1 = arith.constant 0 : index
    %c0_2 = arith.constant 0 : index
    %1 = vector.load %arg5[%c0_1, %c0_2] : memref<4x128xf32, #tpu.memory_space<vmem>>, vector<4x128xf32>
    %2 = vector.extract_strided_slice %1 {offsets = [0, 0], sizes = [1, 128], strides = [1, 1]} : vector<4x128xf32> to vector<1x128xf32>
    %3 = vector.extract_strided_slice %1 {offsets = [1, 0], sizes = [1, 128], strides = [1, 1]} : vector<4x128xf32> to vector<1x128xf32>
    %4 = vector.extract_strided_slice %1 {offsets = [2, 0], sizes = [1, 128], strides = [1, 1]} : vector<4x128xf32> to vector<1x128xf32>
    %5 = vector.extract_strided_slice %1 {offsets = [3, 0], sizes = [1, 128], strides = [1, 1]} : vector<4x128xf32> to vector<1x128xf32>
    %c0_3 = arith.constant 0 : index
    %c0_4 = arith.constant 0 : index
    %6 = vector.load %arg2[%c0_3, %c0_4] : memref<16x128xf32, #tpu.memory_space<vmem>>, vector<16x128xf32>
    %cst = arith.constant dense<0.000000e+00> : vector<8x128xf32>
    %7 = tpu.matmul %0, %6, %cst {dimension_numbers = #tpu.dot_dimension_numbers<[1], [0], [0], [1], [0, 0, 1, 1], [], []>} : vector<8x16xf32>, vector<16x128xf32>, vector<8x128xf32> -> vector<8x128xf32>
    %8 = vector.broadcast %2 : vector<1x128xf32> to vector<8x128xf32>
    %9 = arith.addf %7, %8 : vector<8x128xf32>
    %c0_5 = arith.constant 0 : index
    %c0_6 = arith.constant 0 : index
    %10 = vector.load %arg4[%c0_5, %c0_6] : memref<128x128xf32, #tpu.memory_space<vmem>>, vector<128x128xf32>
    %cst_7 = arith.constant dense<0.000000e+00> : vector<8x128xf32>
    %11 = tpu.matmul %9, %10, %cst_7 {dimension_numbers = #tpu.dot_dimension_numbers<[1], [0], [0], [1], [0, 0, 1, 1], [], []>} : vector<8x128xf32>, vector<128x128xf32>, vector<8x128xf32> -> vector<8x128xf32>
    %12 = arith.mulf %9, %9 : vector<8x128xf32>
    %cst_8 = arith.constant dense<0.000000e+00> : vector<8x128xf32>
    %13 = tpu.matmul %12, %10, %cst_8 {dimension_numbers = #tpu.dot_dimension_numbers<[1], [0], [0], [1], [0, 0, 1, 1], [], []>} : vector<8x128xf32>, vector<128x128xf32>, vector<8x128xf32> -> vector<8x128xf32>
    %14 = arith.mulf %11, %11 : vector<8x128xf32>
    %15 = arith.subf %13, %14 : vector<8x128xf32>
    %cst_9 = arith.constant 0.000000e+00 : f32
    %16 = vector.broadcast %cst_9 : f32 to vector<8x128xf32>
    %17 = arith.maximumf %15, %16 : vector<8x128xf32>
    %cst_10 = arith.constant 9.99999974E-6 : f32
    %18 = vector.broadcast %cst_10 : f32 to vector<8x128xf32>
    %19 = arith.addf %17, %18 : vector<8x128xf32>
    %20 = math.rsqrt %19 : vector<8x128xf32>
    %21 = vector.broadcast %3 : vector<1x128xf32> to vector<8x128xf32>
    %22 = arith.mulf %21, %20 : vector<8x128xf32>
    %23 = arith.subf %9, %11 : vector<8x128xf32>
    %24 = arith.mulf %23, %22 : vector<8x128xf32>
    %25 = vector.broadcast %4 : vector<1x128xf32> to vector<8x128xf32>
    %26 = arith.addf %24, %25 : vector<8x128xf32>
    %cst_11 = arith.constant 0.000000e+00 : f32
    %27 = vector.broadcast %cst_11 : f32 to vector<8x128xf32>
    %28 = arith.maximumf %26, %27 : vector<8x128xf32>
    %c0_12 = arith.constant 0 : index
    %c0_13 = arith.constant 0 : index
    %29 = vector.load %arg3[%c0_12, %c0_13] : memref<128x128xf32, #tpu.memory_space<vmem>>, vector<128x128xf32>
    %cst_14 = arith.constant dense<0.000000e+00> : vector<8x128xf32>
    %30 = tpu.matmul %28, %29, %cst_14 {dimension_numbers = #tpu.dot_dimension_numbers<[1], [0], [0], [1], [0, 0, 1, 1], [], []>} : vector<8x128xf32>, vector<128x128xf32>, vector<8x128xf32> -> vector<8x128xf32>
    %31 = vector.broadcast %5 : vector<1x128xf32> to vector<8x128xf32>
    %32 = arith.addf %30, %31 : vector<8x128xf32>
    %c0_15 = arith.constant 0 : index
    %c0_16 = arith.constant 0 : index
    %33 = vector.load %arg6[%c0_15, %c0_16] : memref<8x128xf32, #tpu.memory_space<vmem>>, vector<8x128xf32>
    tpu.vector_store %arg6[%c0_15, %c0_16], %32 {strides = array<i32>} : memref<8x128xf32, #tpu.memory_space<vmem>>, vector<8x128xf32>,
    return
  }
  func.func @transform_0(%arg0: i32) -> (i32, i32) {
    %c0_i32 = arith.constant 0 : i32
    %c0_i32_0 = arith.constant 0 : i32
    return %arg0, %c0_i32 : i32, i32
  }
  func.func @transform_1(%arg0: i32) -> (i32, i32) {
    %c0_i32 = arith.constant 0 : i32
    %c0_i32_0 = arith.constant 0 : i32
    %c0_i32_1 = arith.constant 0 : i32
    return %c0_i32, %c0_i32_0 : i32, i32
  }
  func.func @transform_2(%arg0: i32) -> (i32, i32) {
    %c0_i32 = arith.constant 0 : i32
    %c0_i32_0 = arith.constant 0 : i32
    %c0_i32_1 = arith.constant 0 : i32
    return %c0_i32, %c0_i32_0 : i32, i32
  }
  func.func @transform_3(%arg0: i32) -> (i32, i32) {
    %c0_i32 = arith.constant 0 : i32
    %c0_i32_0 = arith.constant 0 : i32
    %c0_i32_1 = arith.constant 0 : i32
    return %c0_i32, %c0_i32_0 : i32, i32
  }
  func.func @transform_4(%arg0: i32) -> (i32, i32) {
    %c0_i32 = arith.constant 0 : i32
    %c0_i32_0 = arith.constant 0 : i32
    %c0_i32_1 = arith.constant 0 : i32
    return %c0_i32, %c0_i32_0 : i32, i32
  }
  func.func @transform_5(%arg0: i32) -> (i32, i32) {
    %c0_i32 = arith.constant 0 : i32
    %c0_i32_0 = arith.constant 0 : i32
    return %arg0, %c0_i32 : i32, i32
  }
}

</mosaic_0001>

<bundles_post_ra>
// kernel: tile.33
= control target key start
LH: loop header
LB: loop body
LE: loop exit
PB: predicated region body
PF: predicated region fallthrough
CT: control target
= control target key end

     0   :  { %s22_s0 = inlined_call_operand.vmem [shape: f32[32], index: 0, kind: input, shape index: {}]   ;;  %s23_s1 = inlined_call_operand.vmem [shape: f32[4,32], index: 1, kind: output, shape index: {}]  }
   0x1   :  { %v4_v0 = vld [vmem:[%s22_s0] ss:$0 sm:$0xff] }
   0x2   :  { %5 = vst [vmem:[%s23_s1] sm:$0xf] %v4_v0 }

// kernel: tile.46
= control target key start
LH: loop header
LB: loop body
LE: loop exit
PB: predicated region body
PF: predicated region fallthrough
CT: control target
= control target key end

     0   :  { %s37_s8 = smov 32   ;;  %s38_s9 = smov 64   ;;  %vm7_vm0 = vcmask 261120   ;;  %vm13_vm1 = vcmask 1048320   ;;  %vm19_vm2 = vcmask 785920   ;;  %vm25_vm3 = vcmask 523520   ;;  %s55_s0 = inlined_call_operand.vmem [shape: f32[4,32], index: 0, kind: input, shape index: {}]   ;;  %s56_s1 = inlined_call_operand.vmem [shape: f32[1,128], index: 1, kind: output, shape index: {}]  }
   0x1   :  { %v4_v0 = vld [vmem:[%s55_s0] sm:$0xf]  ;;  %s36_s0 = smov 96  }
   0x2   :  { %5 = vst [vmem:[#allocation1] sm:$0xf] %v4_v0 }
   0x9   :  { %v10_v1 = vld [vmem:[#allocation1 + $0x3] sm:$0x1]   ;;  %v22_v2 = vld [vmem:[#allocation1 + $0x1] sm:$0x1]   ;;  %v16_v3 = vld [vmem:[#allocation1 + $0x2] sm:$0x1]  }
   0xa   :  { %11 = vrot.lane.b32.xlu0 %v10_v1, %s36_s0  ;;  %23 = vrot.lane.b32.xlu1 %v22_v2, %s37_s8  ;;  %v6_v4 = vld [vmem:[#allocation1] sm:$0x1]  }
   0xb   :  { %8 = vst.msk [vmem:[#allocation0] sm:$0x1] %vm7_vm0, %v6_v4  }
  0x12   :  { %17 = vrot.lane.b32.xlu0 %v16_v3, %s38_s9 }
  0x7c   :  { %v12_v5 = vpop.permute.xlu0 %11   ;;  %v24_v6 = vpop.permute.xlu1 %23  }
  0x7d   :  { %14 = vst.msk [vmem:[#allocation0] sm:$0x1] %vm13_vm1, %v12_v5  }
  0x84   :  { %v18_v7 = vpop.permute.xlu0 %17  }
  0x85   :  { %20 = vst.msk [vmem:[#allocation0] sm:$0x1] %vm19_vm2, %v18_v7  }
  0x86   :  { %26 = vst.msk [vmem:[#allocation0] sm:$0x1] %vm25_vm3, %v24_v6  }
  0x8d   :  { %v29_v8 = vld [vmem:[#allocation0] sm:$0x1] }
  0x8e   :  { %32 = vst [vmem:[%s56_s1] sm:$0x1] %v29_v8 }

// kernel: cs_edge_encoder.1
= control target key start
LH: loop header
LB: loop body
LE: loop exit
PB: predicated region body
PF: predicated region fallthrough
CT: control target
= control target key end

     0   :  { %vm25_vm0 = vcmask 130048   ;;  %s319_s1 = inlined_call_operand.vmem [shape: f32[16,128], index: 1, kind: input, shape index: {}]   ;;  %s320_s0 = inlined_call_operand.vmem [shape: f32[8,16], index: 0, kind: input, shape index: {}]   ;;  %s321_s3 = inlined_call_operand.vmem [shape: f32[128,128], index: 3, kind: input, shape index: {}]   ;;  %s322_s4 = inlined_call_operand.vmem [shape: f32[4,128], index: 4, kind: input, shape index: {}]   ;;  %s323_s2 = inlined_call_operand.vmem [shape: f32[128,128], index: 2, kind: input, shape index: {}]   ;;  %s324_s5 = inlined_call_operand.vmem [shape: f32[8,128], index: 5, kind: output, shape index: {}]  }
   0x1   :  { %v23_v0 = vld [vmem:[%s319_s1 + $0x8] sm:$0xff]  ;;  %v22_v1 = vld [vmem:[%s319_s1] sm:$0xff]  ;;  %v64_v3 = vld [vmem:[%s321_s3 + $0x78] sm:$0xff] }
   0x2   :  { %43 = vmatpush.msra.mxu0 %v23_v0  ;;  %v20_v2 = vld [vmem:[%s320_s0] sm:$0xff]  ;;  %v63_v4 = vld [vmem:[%s321_s3 + $0x70] sm:$0xff]  ;;  %65 = vmatpush.msra.mxu1 %v64_v3  ;;  %v62_v5 = vld [vmem:[%s321_s3 + $0x68] sm:$0xff] }
   0x3   :  { %86 = vmatpush.msra.mxu2 %v64_v3  ;;  %v61_v6 = vld [vmem:[%s321_s3 + $0x60] sm:$0xff]  ;;  %v60_v7 = vld [vmem:[%s321_s3 + $0x58] sm:$0xff]  ;;  %v59_v8 = vld [vmem:[%s321_s3 + $0x50] sm:$0xff] }
   0x4   :  { %44 = vmatpush.msra.mxu0 %v22_v1  ;;  %66 = vmatpush.msra.mxu1 %v63_v4  ;;  %v58_v9 = vld [vmem:[%s321_s3 + $0x48] sm:$0xff]  ;;  %v57_v10 = vld [vmem:[%s321_s3 + $0x40] sm:$0xff]  ;;  %v56_v11 = vld [vmem:[%s321_s3 + $0x38] sm:$0xff] }
   0x5   :  { %169 = vmatmul.msk.f32.vlgmr.msra.gmra.mxu0 %vm25_vm0, %v20_v2  ;;  %87 = vmatpush.msra.mxu2 %v63_v4  ;;  %v55_v12 = vld [vmem:[%s321_s3 + $0x30] sm:$0xff]  ;;  %v54_v13 = vld [vmem:[%s321_s3 + $0x28] sm:$0xff]  ;;  %v53_v14 = vld [vmem:[%s321_s3 + $0x20] sm:$0xff] }
   0x6   :  { %67 = vmatpush.msra.mxu1 %v62_v5  ;;  %v52_v15 = vld [vmem:[%s321_s3 + $0x18] sm:$0xff]  ;;  %v51_v16 = vld [vmem:[%s321_s3 + $0x10] sm:$0xff]  ;;  %v50_v17 = vld [vmem:[%s321_s3 + $0x8] sm:$0xff] }
   0x7   :  { %88 = vmatpush.msra.mxu2 %v62_v5  ;;  %v49_v18 = vld [vmem:[%s321_s3] sm:$0xff]  ;;  %v142_v24 = vld [vmem:[%s323_s2 + $0x78] sm:$0xff]  ;;  %v141_v25 = vld [vmem:[%s323_s2 + $0x70] sm:$0xff] }
   0x8   :  { %68 = vmatpush.msra.mxu1 %v61_v6  ;;  %v262_v19 = vld [vmem:[%s322_s4] sm:$0xf]  ;;  %144 = vmatpush.msra.mxu3 %v142_v24  ;;  %v140_v26 = vld [vmem:[%s323_s2 + $0x68] sm:$0xff]  ;;  %v138_v28 = vld [vmem:[%s323_s2 + $0x58] sm:$0xff] }
   0x9   :  { %89 = vmatpush.msra.mxu2 %v61_v6  ;;  %v24_v20 = vperm.slane %v262_v19, 0  ;;  %v139_v27 = vld [vmem:[%s323_s2 + $0x60] sm:$0xff]  ;;  %v137_v29 = vld [vmem:[%s323_s2 + $0x50] sm:$0xff]  ;;  %v136_v30 = vld [vmem:[%s323_s2 + $0x48] sm:$0xff]  ;;  %v120_v51 = vperm.slane %v262_v19, 1  ;;  %v124_v56 = vperm.slane %v262_v19, 2 }
   0xa   :  { %69 = vmatpush.msra.mxu1 %v60_v7  ;;  %145 = vmatpush.msra.mxu3 %v141_v25  ;;  %v135_v31 = vld [vmem:[%s323_s2 + $0x40] sm:$0xff]  ;;  %v134_v32 = vld [vmem:[%s323_s2 + $0x38] sm:$0xff]  ;;  %v133_v33 = vld [vmem:[%s323_s2 + $0x30] sm:$0xff]  ;;  %v143_v60 = vperm.slane %v262_v19, 3 }
   0xb   :  { %90 = vmatpush.msra.mxu2 %v60_v7  ;;  %v132_v34 = vld [vmem:[%s323_s2 + $0x28] sm:$0xff]  ;;  %v131_v35 = vld [vmem:[%s323_s2 + $0x20] sm:$0xff]  ;;  %v130_v36 = vld [vmem:[%s323_s2 + $0x18] sm:$0xff] }
   0xc   :  { %70 = vmatpush.msra.mxu1 %v59_v8  ;;  %146 = vmatpush.msra.mxu3 %v140_v26  ;;  %v129_v37 = vld [vmem:[%s323_s2 + $0x10] sm:$0xff]  ;;  %v128_v38 = vld [vmem:[%s323_s2 + $0x8] sm:$0xff]  ;;  %v127_v40 = vld [vmem:[%s323_s2] sm:$0xff] }
   0xd   :  { %91 = vmatpush.msra.mxu2 %v59_v8 }
   0xe   :  { %71 = vmatpush.msra.mxu1 %v58_v9  ;;  %147 = vmatpush.msra.mxu3 %v139_v27 }
   0xf   :  { %92 = vmatpush.msra.mxu2 %v58_v9 }
  0x10   :  { %72 = vmatpush.msra.mxu1 %v57_v10  ;;  %148 = vmatpush.msra.mxu3 %v138_v28 }
  0x11   :  { %93 = vmatpush.msra.mxu2 %v57_v10 }
  0x12   :  { %73 = vmatpush.msra.mxu1 %v56_v11  ;;  %149 = vmatpush.msra.mxu3 %v137_v29 }
  0x13   :  { %94 = vmatpush.msra.mxu2 %v56_v11 }
  0x14   :  { %74 = vmatpush.msra.mxu1 %v55_v12  ;;  %150 = vmatpush.msra.mxu3 %v136_v30 }
  0x15   :  { %95 = vmatpush.msra.mxu2 %v55_v12 }
  0x16   :  { %75 = vmatpush.msra.mxu1 %v54_v13  ;;  %151 = vmatpush.msra.mxu3 %v135_v31 }
  0x17   :  { %96 = vmatpush.msra.mxu2 %v54_v13 }
  0x18   :  { %76 = vmatpush.msra.mxu1 %v53_v14  ;;  %152 = vmatpush.msra.mxu3 %v134_v32 }
  0x19   :  { %97 = vmatpush.msra.mxu2 %v53_v14 }
  0x1a   :  { %77 = vmatpush.msra.mxu1 %v52_v15  ;;  %153 = vmatpush.msra.mxu3 %v133_v33 }
  0x1b   :  { %98 = vmatpush.msra.mxu2 %v52_v15 }
  0x1c   :  { %78 = vmatpush.msra.mxu1 %v51_v16  ;;  %154 = vmatpush.msra.mxu3 %v132_v34 }
  0x1d   :  { %99 = vmatpush.msra.mxu2 %v51_v16 }
  0x1e   :  { %79 = vmatpush.msra.mxu1 %v50_v17  ;;  %155 = vmatpush.msra.mxu3 %v131_v35 }
  0x1f   :  { %100 = vmatpush.msra.mxu2 %v50_v17 }
  0x20   :  { %80 = vmatpush.msra.mxu1 %v49_v18  ;;  %156 = vmatpush.msra.mxu3 %v130_v36 }
  0x21   :  { %101 = vmatpush.msra.mxu2 %v49_v18 }
  0x22   :  { %157 = vmatpush.msra.mxu3 %v129_v37 }
  0x24   :  { %158 = vmatpush.msra.mxu3 %v128_v38 }
  0x26   :  { %159 = vmatpush.msra.mxu3 %v127_v40 }
  0x82   :  { %v46_v21 = vpop.f32.mrf.mxu0 }
  0x83   :  { %v47_v22 = vadd.f32 %v46_v21, %v24_v20 }
  0x85   :  { %81 = vmatmul.f32.vlgmr.msra.gmra.mxu1 %v47_v22  ;;  %v85_v23 = vmul.f32 %v47_v22, %v47_v22 }
  0x87   :  { %102 = vmatmul.f32.vlgmr.msra.gmra.mxu2 %v85_v23 }
 0x102   :  { %v82_v39 = vpop.f32.mrf.mxu1 }
 0x103   :  { %v106_v41 = vmul.f32 %v82_v39, %v82_v39  ;;  %v122_v54 = vsub.f32 %v47_v22, %v82_v39 }
 0x10a   :  { %v103_v42 = vpop.f32.mrf.mxu2 }
 0x10b   :  { %v107_v43 = vsub.f32 %v103_v42, %v106_v41 }
 0x10d   :  { %v108_v44 = vmax.f32 %v107_v43, 0.0 }
 0x10f   :  { %v109_v45 = vadd.f32 1e-05, %v108_v44 }
 0x111   :  { %170 = vrsqrt.f32 %v109_v45  ;;  %vm116_vm2 = vweird.f32 %v109_v45 }
 0x117   :  { %v171_v46 = vpop.eup %170 }
 0x118   :  { %v111_v47 = vmul.f32 %v171_v46, %v109_v45  ;;  %vm117_vm1 = vweird.f32 %v171_v46 }
 0x119   :  { %vm118_vm3 = vmor %vm116_vm2, %vm117_vm1 }
 0x11a   :  { %v112_v48 = vmul.f32 %v171_v46, %v111_v47 }
 0x11c   :  { %v113_v49 = vmul.f32 0.5, %v112_v48 }
 0x11e   :  { %v114_v50 = vsub.f32 1.5, %v113_v49 }
 0x120   :  { %v115_v52 = vmul.f32 %v171_v46, %v114_v50 }
 0x122   :  { %v119_v53 = vsel %vm118_vm3, %v171_v46, %v115_v52 }
 0x123   :  { %v121_v55 = vmul.f32 %v120_v51, %v119_v53 }
 0x125   :  { %v123_v57 = vmul.f32 %v122_v54, %v121_v55 }
 0x127   :  { %v125_v58 = vadd.f32 %v124_v56, %v123_v57 }
 0x129   :  { %v126_v59 = vmax.f32 %v125_v58, 0.0 }
 0x12b   :  { %160 = vmatmul.f32.vlgmr.msra.gmra.mxu3 %v126_v59 }
 0x1ae   :  { %v161_v61 = vpop.f32.mrf.mxu3 }
 0x1af   :  { %v162_v62 = vadd.f32 %v161_v61, %v143_v60 }
 0x1b1   :  { %164 = vst [vmem:[%s324_s5] sm:$0xff] %v162_v62 }

</bundles_post_ra>
